<compile_context>
chip_gen: v7x
topology: tpu7x:2x2x1
jax: 0.10.0
libtpu: 0.0.40
codegen_flags: <defaults>
</compile_context>

<pallas_src>
import math

import jax
import jax.numpy as jnp
from jax.experimental import pallas as pl
from jax.experimental.pallas import tpu as pltpu


def _round_up(v, m):
    return ((v + m - 1) // m) * m


def bond_angle_rbf_kernel(x_ref, expand_ref, centers_ref, gammas_ref,
                          w_ref, b_ref, o_ref):
    """One lane-packed edge tile of the BondAngleFloatRBF forward.

    x_ref:       [TEp, PW]     P packed angles per row (PW-P pad cols are 0)
    expand_ref:  [PW, P*K]     exact 0/1 lane-expansion matrix
    centers_ref: [1,  P*K]     RBF centers, tiled P times
    gammas_ref:  [1,  P*K]     RBF gammas,  tiled P times
    w_ref:       [P*K, P*D]    block-diagonal stacked linear weight
    b_ref:       [1,  P*D]     summed bias, tiled P times
    o_ref:       [TEp, P*D]    lane-dense output block
    """
    # Broadcast each packed angle across its K center lanes (exact: 0/1 matrix).
    xe = jnp.dot(x_ref[...], expand_ref[...],
                 preferred_element_type=jnp.float32)          # [TEp, P*K]
    diff = xe - centers_ref[...]                              # VPU
    rbf = jnp.exp(-gammas_ref[...] * diff * diff)             # EUP, 128-lane dense
    acc = jnp.dot(rbf.astype(w_ref.dtype), w_ref[...],
                  preferred_element_type=jnp.float32)         # single MXU matmul
    o_ref[...] = acc + b_ref[...]                             # lane-dense store


def bond_angle_float_rbf(x, centers, gammas, w, b, *, tile_e=8192,
                         use_bf16_matmul=False):
    """x: any-shape float angles; returns [N, D] where N = x.size.

    centers/gammas: fused per-center params (any shape, K entries total)
    w: [K, D] stacked W_f^T;  b: summed bias [D] (or [1, D])
    tile_e: edge rows per grid step (rounded to the packing/sublane alignment).
    """
    x = jnp.asarray(x, jnp.float32).reshape(-1)
    E = int(x.shape[0])
    centers = jnp.asarray(centers, jnp.float32).reshape(-1)
    gammas = jnp.asarray(gammas, jnp.float32).reshape(-1)
    w = jnp.asarray(w, jnp.float32)
    b = jnp.asarray(b, jnp.float32).reshape(-1)
    K, D = w.shape

    # ---- lane packing factor (P edge rows folded per vreg row) -------------
    P = max(1, 128 // max(K, D))      # K=D=32 -> P=4 -> 128-lane dense blocks
    PW = _round_up(P, 8)              # pad packed width to a full sublane group
    row_align = 8 * P                 # edge rows per tile must be a multiple

    # ---- tile sizing --------------------------------------------------------
    tile_e = max(row_align, (int(tile_e) // row_align) * row_align)
    if E > row_align:
        # Guarantee >= 2 grid steps when there is enough work so the
        # "parallel" grid axis can shard across both v7x TensorCores.
        half = _round_up(pl.cdiv(E, 2), row_align)
        tile_e = max(row_align, min(tile_e, half))

    num_tiles = pl.cdiv(E, tile_e)
    E_pad = num_tiles * tile_e
    if E_pad != E:
        x = jnp.pad(x, (0, E_pad - E))

    # ---- packed operands (built once, tiny, VMEM-resident in the kernel) ---
    x_packed = x.reshape(E_pad // P, P)
    if PW != P:
        x_packed = jnp.pad(x_packed, ((0, 0), (0, PW - P)))
    expand = jnp.repeat(jnp.eye(P, dtype=jnp.float32), K, axis=1)   # [P, P*K]
    if PW != P:
        expand = jnp.pad(expand, ((0, PW - P), (0, 0)))             # [PW, P*K]
    centers_t = jnp.tile(centers, P)[None, :]                       # [1, P*K]
    gammas_t = jnp.tile(gammas, P)[None, :]                         # [1, P*K]
    w_dtype = jnp.bfloat16 if use_bf16_matmul else jnp.float32
    w_blk = jnp.kron(jnp.eye(P, dtype=jnp.float32), w).astype(w_dtype)  # [P*K, P*D]
    b_t = jnp.tile(b, P)[None, :]                                   # [1, P*D]

    tep = tile_e // P
    PK = P * K
    PD = P * D
    f32 = 4

    # ---- explicit VMEM budget (v7x: 64 MiB physical / 32 MiB scoped default)
    need = (2 * tep * PW * f32                 # double-buffered x block
            + 2 * tep * PD * f32               # double-buffered out block
            + 3 * tep * PK * f32               # rbf intermediates
            + 2 * (PW * PK + 2 * PK + PK * PD + PD) * f32   # constants
            + (1 << 20))                       # slack
    vmem_limit = int(min(max(need, 16 << 20), 64 << 20))

    cost = pl.CostEstimate(
        flops=2 * (E_pad // P) * PK * (PD + PW),
        transcendentals=E_pad * K,
        bytes_accessed=f32 * ((E_pad // P) * PW + E_pad * D
                              + PW * PK + 2 * PK + PK * PD + PD),
    )

    out = pl.pallas_call(
        bond_angle_rbf_kernel,
        out_shape=jax.ShapeDtypeStruct((E_pad // P, PD), jnp.float32),
        grid_spec=pltpu.PrefetchScalarGridSpec(
            num_scalar_prefetch=0,
            grid=(num_tiles,),
            in_specs=[
                pl.BlockSpec((tep, PW), lambda i: (i, 0)),   # packed angles
                pl.BlockSpec((PW, PK), lambda i: (0, 0)),    # expansion matrix
                pl.BlockSpec((1, PK), lambda i: (0, 0)),     # centers (resident)
                pl.BlockSpec((1, PK), lambda i: (0, 0)),     # gammas  (resident)
                pl.BlockSpec((PK, PD), lambda i: (0, 0)),    # block-diag W
                pl.BlockSpec((1, PD), lambda i: (0, 0)),     # tiled bias
            ],
            out_specs=pl.BlockSpec((tep, PD), lambda i: (i, 0)),
        ),
        compiler_params=pltpu.CompilerParams(
            dimension_semantics=("parallel",),
            vmem_limit_bytes=vmem_limit,
        ),
        cost_estimate=cost,
    )(x_packed, expand, centers_t, gammas_t, w_blk, b_t)

    # Un-pack: (E_pad/P, P*D) -> (E_pad, D) is a contiguous row-major reshape.
    out = out.reshape(E_pad, D)
    if E_pad != E:
        # Padded rows hold garbage (exp of pad zeros); slice only when needed
        # so tile-aligned callers pay no extra HBM copy.
        out = out[:E]
    return out


def build_params(key, bond_angle_float_names, embed_dim, rbf_params=None):
    """Deterministic stand-in for the module's RBF + nn.Linear parameters.

    Returns fused params: centers [1, Ktot], gammas [1, Ktot],
    W [Ktot, D] (stacked W_f^T), b [1, D] (summed biases).
    """
    if rbf_params is None:
        rbf_params = {
            "bond_angle": (jnp.arange(0.0, math.pi, 0.1, dtype=jnp.float32), 10.0)
        }
    centers_list, gammas_list, w_list = [], [], []
    b_sum = jnp.zeros((1, embed_dim), jnp.float32)
    for i, name in enumerate(bond_angle_float_names):
        c, g = rbf_params[name]
        c = jnp.asarray(c, jnp.float32).reshape(-1)
        k = c.shape[0]
        kw, kb = jax.random.split(jax.random.fold_in(key, i))
        bound = 1.0 / (k ** 0.5)  # mimic nn.Linear default init range
        w_t = jax.random.uniform(kw, (k, embed_dim), jnp.float32, -bound, bound)
        bias = jax.random.uniform(kb, (embed_dim,), jnp.float32, -bound, bound)
        centers_list.append(c)
        gammas_list.append(jnp.full((k,), float(g), jnp.float32))
        w_list.append(w_t)
        b_sum = b_sum + bias[None, :]
    centers = jnp.concatenate(centers_list)[None, :]
    gammas = jnp.concatenate(gammas_list)[None, :]
    w = jnp.concatenate(w_list, axis=0)
    return centers, gammas, w, b_sum


def reference(x, centers, gammas, w, b):
    x = jnp.asarray(x, jnp.float32).reshape(-1, 1)
    rbf = jnp.exp(-gammas * jnp.square(x - centers))
    return jnp.dot(rbf, w, precision=jax.lax.Precision.HIGHEST) + b


if __name__ == "__main__":
    EMBED_DIM = 32
    NUM_ANGLES = 200          # deliberately NOT tile- or pack-aligned
    TILE_E = 256              # small for the demo; auto-capped to >=2 grid steps
    NAMES = ["bond_angle"]

    key = jax.random.PRNGKey(0)
    k_par, k_x = jax.random.split(key)

    centers, gammas, w, b = build_params(k_par, NAMES, EMBED_DIM)

    # Bond angles in [0, pi)
    x = jax.random.uniform(k_x, (NUM_ANGLES,), jnp.float32, 0.0, math.pi)

    out = bond_angle_float_rbf(x, centers, gammas, w, b, tile_e=TILE_E)
    out = jax.block_until_ready(out)

    ref = reference(x, centers, gammas, w, b)
    assert out.shape == (NUM_ANGLES, EMBED_DIM), out.shape
    assert jnp.allclose(out, ref, atol=1e-5, rtol=1e-5), (
        "mismatch vs reference, max abs err = "
        + str(float(jnp.max(jnp.abs(out - ref)))))

    print("KERNEL_OK")
</pallas_src>

<mosaic_0001>
module attributes {stable_mosaic.version = 11 : i64} {
  func.func @bond_angle_rbf_kernel(%arg0: i32, %arg1: memref<32x8xf32, #tpu.memory_space<vmem>>, %arg2: memref<8x128xf32, #tpu.memory_space<vmem>>, %arg3: memref<1x128xf32, #tpu.memory_space<vmem>>, %arg4: memref<1x128xf32, #tpu.memory_space<vmem>>, %arg5: memref<128x128xf32, #tpu.memory_space<vmem>>, %arg6: memref<1x128xf32, #tpu.memory_space<vmem>>, %arg7: memref<32x128xf32, #tpu.memory_space<vmem>>) attributes {dimension_semantics = [#tpu.dimension_semantics<parallel>], iteration_bounds = array<i64: 2>, scalar_prefetch = 0 : i64, scratch_operands = 0 : i64, tpu.core_type = #tpu.core_type<tc>, window_params = [{transform_indices = @transform_0, window_bounds = array<i64: 32, 8>}, {pipeline_mode = #tpu.pipeline_mode<synchronous>, transform_indices = @transform_1, window_bounds = array<i64: 8, 128>}, {pipeline_mode = #tpu.pipeline_mode<synchronous>, transform_indices = @transform_2, window_bounds = array<i64: 1, 128>}, {pipeline_mode = #tpu.pipeline_mode<synchronous>, transform_indices = @transform_3, window_bounds = array<i64: 1, 128>}, {pipeline_mode = #tpu.pipeline_mode<synchronous>, transform_indices = @transform_4, window_bounds = array<i64: 128, 128>}, {pipeline_mode = #tpu.pipeline_mode<synchronous>, transform_indices = @transform_5, window_bounds = array<i64: 1, 128>}, {transform_indices = @transform_6, window_bounds = array<i64: 32, 128>}]} {
    %c0 = arith.constant 0 : index
    %c0_0 = arith.constant 0 : index
    %0 = vector.load %arg1[%c0, %c0_0] : memref<32x8xf32, #tpu.memory_space<vmem>>, vector<32x8xf32>
    %c0_1 = arith.constant 0 : index
    %c0_2 = arith.constant 0 : index
    %1 = vector.load %arg2[%c0_1, %c0_2] : memref<8x128xf32, #tpu.memory_space<vmem>>, vector<8x128xf32>
    %cst = arith.constant dense<0.000000e+00> : vector<32x128xf32>
    %2 = tpu.matmul %0, %1, %cst {dimension_numbers = #tpu.dot_dimension_numbers<[1], [0], [0], [1], [0, 0, 1, 1], [], []>} : vector<32x8xf32>, vector<8x128xf32>, vector<32x128xf32> -> vector<32x128xf32>
    %c0_3 = arith.constant 0 : index
    %c0_4 = arith.constant 0 : index
    %3 = vector.load %arg3[%c0_3, %c0_4] : memref<1x128xf32, #tpu.memory_space<vmem>>, vector<1x128xf32>
    %4 = vector.broadcast %3 : vector<1x128xf32> to vector<32x128xf32>
    %5 = arith.subf %2, %4 : vector<32x128xf32>
    %c0_5 = arith.constant 0 : index
    %c0_6 = arith.constant 0 : index
    %6 = vector.load %arg4[%c0_5, %c0_6] : memref<1x128xf32, #tpu.memory_space<vmem>>, vector<1x128xf32>
    %cst_7 = arith.constant 0.000000e+00 : f32
    %7 = vector.broadcast %cst_7 : f32 to vector<1x128xf32>
    %8 = arith.subf %7, %6 : vector<1x128xf32>
    %9 = vector.broadcast %8 : vector<1x128xf32> to vector<32x128xf32>
    %10 = arith.mulf %9, %5 : vector<32x128xf32>
    %11 = arith.mulf %10, %5 : vector<32x128xf32>
    %12 = math.exp %11 : vector<32x128xf32>
    %c0_8 = arith.constant 0 : index
    %c0_9 = arith.constant 0 : index
    %13 = vector.load %arg5[%c0_8, %c0_9] : memref<128x128xf32, #tpu.memory_space<vmem>>, vector<128x128xf32>
    %cst_10 = arith.constant dense<0.000000e+00> : vector<32x128xf32>
    %14 = tpu.matmul %12, %13, %cst_10 {dimension_numbers = #tpu.dot_dimension_numbers<[1], [0], [0], [1], [0, 0, 1, 1], [], []>} : vector<32x128xf32>, vector<128x128xf32>, vector<32x128xf32> -> vector<32x128xf32>
    %c0_11 = arith.constant 0 : index
    %c0_12 = arith.constant 0 : index
    %15 = vector.load %arg6[%c0_11, %c0_12] : memref<1x128xf32, #tpu.memory_space<vmem>>, vector<1x128xf32>
    %16 = vector.broadcast %15 : vector<1x128xf32> to vector<32x128xf32>
    %17 = arith.addf %14, %16 : vector<32x128xf32>
    %c0_13 = arith.constant 0 : index
    %c0_14 = arith.constant 0 : index
    %18 = vector.load %arg7[%c0_13, %c0_14] : memref<32x128xf32, #tpu.memory_space<vmem>>, vector<32x128xf32>
    tpu.vector_store %arg7[%c0_13, %c0_14], %17 {strides = array<i32>} : memref<32x128xf32, #tpu.memory_space<vmem>>, vector<32x128xf32>,
    return
  }
  func.func @transform_0(%arg0: i32) -> (i32, i32) {
    %c0_i32 = arith.constant 0 : i32
    %c0_i32_0 = arith.constant 0 : i32
    return %arg0, %c0_i32 : i32, i32
  }
  func.func @transform_1(%arg0: i32) -> (i32, i32) {
    %c0_i32 = arith.constant 0 : i32
    %c0_i32_0 = arith.constant 0 : i32
    %c0_i32_1 = arith.constant 0 : i32
    return %c0_i32, %c0_i32_0 : i32, i32
  }
  func.func @transform_2(%arg0: i32) -> (i32, i32) {
    %c0_i32 = arith.constant 0 : i32
    %c0_i32_0 = arith.constant 0 : i32
    %c0_i32_1 = arith.constant 0 : i32
    return %c0_i32, %c0_i32_0 : i32, i32
  }
  func.func @transform_3(%arg0: i32) -> (i32, i32) {
    %c0_i32 = arith.constant 0 : i32
    %c0_i32_0 = arith.constant 0 : i32
    %c0_i32_1 = arith.constant 0 : i32
    return %c0_i32, %c0_i32_0 : i32, i32
  }
  func.func @transform_4(%arg0: i32) -> (i32, i32) {
    %c0_i32 = arith.constant 0 : i32
    %c0_i32_0 = arith.constant 0 : i32
    %c0_i32_1 = arith.constant 0 : i32
    return %c0_i32, %c0_i32_0 : i32, i32
  }
  func.func @transform_5(%arg0: i32) -> (i32, i32) {
    %c0_i32 = arith.constant 0 : i32
    %c0_i32_0 = arith.constant 0 : i32
    %c0_i32_1 = arith.constant 0 : i32
    return %c0_i32, %c0_i32_0 : i32, i32
  }
  func.func @transform_6(%arg0: i32) -> (i32, i32) {
    %c0_i32 = arith.constant 0 : i32
    %c0_i32_0 = arith.constant 0 : i32
    return %arg0, %c0_i32 : i32, i32
  }
}

</mosaic_0001>

<bundles_post_ra>
// kernel: tpu_custom_call.1
= control target key start
LH: loop header
LB: loop body
LE: loop exit
PB: predicated region body
PF: predicated region fallthrough
CT: control target
= control target key end

     0   :  { %11 = vsyncpa [#allocation3], 0  ;;  %s1098_s0 = inlined_call_operand.vmem [shape: f32[64,8], index: 0, kind: input, shape index: {}]   ;;  %s1099_s1 = inlined_call_operand.vmem [shape: f32[8,128], index: 1, kind: input, shape index: {}]   ;;  %s1100_s2 = inlined_call_operand.vmem [shape: f32[1,128], index: 2, kind: input, shape index: {}]   ;;  %s1101_s3 = inlined_call_operand.vmem [shape: f32[1,128], index: 3, kind: input, shape index: {}]   ;;  %s1102_s4 = inlined_call_operand.hbm [shape: f32[128,128], index: 4, kind: input, shape index: {}]   ;;  %s1103_s5 = inlined_call_operand.vmem [shape: f32[1,128], index: 5, kind: input, shape index: {}]   ;;  %s1104_s6 = inlined_call_operand.hbm [shape: f32[64,128], index: 6, kind: output, shape index: {}]  }
   0x1   :  { %12 = vsyncpa [#allocation4], 0 }
   0x2   :  { %14 = vsyncpa [#allocation4 + $0x1], 0  ;;  %s945_s21 = smov 0   ;;  %s947_s22 = smov 0  }
   0x3   :  { %s949_s23 = smov 0   ;;  %s951_s24 = smov 0  }
   0x4 LB: > { %s966_s25 = sadd.s32 4294967295, %s902_s24   ;;  %s606_s26 = sadd.s32 4294967294, %s902_s24   ;;  %s902_s24 = sphi %s951_s24, %s1120_s24   ;;  %s898_s23 = sphi %s949_s23, %s1119_s23   ;;  %s894_s22 = sphi %s947_s22, %s1118_s22   ;;  %s890_s21 = sphi %s945_s21, %s1117_s21  }
   0x5   : > { %s970_s27 = sadd.s32 1, %s902_s24   ;;  %s158_s28 = sadd.s32 1, %s898_s23 }
   0x6   : > { %s155_s29 = ssub.s32 %s902_s24, %s970_s27  ;;  %p168_p0 = scmp.ne.s32.totalorder %s898_s23, %s894_s22 }
   0x7   : > { %p156_p1 = scmp.eq.s32.totalorder %s155_s29, 0  ;;  %p169_p2 = scmp.eq.s32.totalorder %s966_s25, 1 }
   0x8   : > { %p174_p3 = scmp.ne.s32.totalorder %s894_s22, %s890_s21  ;;  %p175_p4 = scmp.eq.s32.totalorder %s606_s26, 1 }
   0x9   : > { %s981_s30 = scalar_select %p156_p1, %s898_s23, %s158_s28  }
   0xa   : > { %p983_p5 = por %p169_p2, %p168_p0  ;;  %p987_p6 = por %p175_p4, %p174_p3 }
   0xb   : > { %p607_p7 = scmp.ge.s32.totalorder %s902_s24, 1  ;;  %p182_p8 = scmp.lt.s32.totalorder %s902_s24, 3 }
   0xc   : > { %s1108_s7 = scalar_select %p983_p5, 1, 0 }
   0xd   : > { %s1109_s8 = scalar_select %p987_p6, 1, 0 }
   0xe   : > { %p1105_p9 = scmp.eq.s32.totalorder %s966_s25, 0  ;;  %p994_p10 = pnand %p607_p7, %p182_p8 }
   0xf   : > { %s904_s10 = smov [#allocation2]   ;;  %s808_s15 = scalar_lea.hbm %s1102_s4, 2048 }
  0x10   : > { %s1110_s9 = scalar_select %p994_p10, 1, 0 }
  0x11   : > { %s203_s11 = sshll.u32 %s904_s10, 4  ;;  %p752_p11 = pneg %p994_p10  ;;  %s204_s11 = int_to_ptr.vmem [resolvable:$true] %s203_s11 }
  0x12   : > { %p809_p13 = scmp.ne.s32.totalorder %s1102_s4, %s808_s15  ;;  %p815_p3 = scmp.lt.u32.totalorder %s808_s15, %s1102_s4 }
  0x13   : > { %p1002_p12 = pnand %p1105_p9, %p752_p11 }
  0x15   : > { %p810_p0 = pneg %p1002_p12 }
  0x17   : > { %p811_p1 = pnand %p810_p0, %p809_p13 }
  0x19   : > { %p812_p2 = pneg %p811_p1 }
  0x1b   : > { %p817_p4 = pnand %p815_p3, %p812_p2 }
  0x1d   : > { %820 = shalt.err (!%p817_p4)
}
  0x1e   : > { %s821_s20 = scalar_lea.vmem %s204_s11, 2048  ;;  %p829_p9 = scmp.lt.s32.totalorder %s204_s11, %s204_s11 }
  0x1f   : > { %p822_p7 = scmp.ne.s32.totalorder %s204_s11, %s821_s20  ;;  %p830_p6 = scmp.lt.s32.totalorder %s821_s20, %s821_s20 }
  0x21   : > { %p824_p8 = pnand %p822_p7, %p810_p0  ;;  %p831_p5 = por %p830_p6, %p829_p9 }
  0x23   : > { %p825_p11 = pneg %p824_p8 }
  0x25   : > { %p832_p10 = pnand %p831_p5, %p825_p11 }
  0x27   : > { %835 = shalt.err (!%p832_p10)
}
  0x28   : > { %s905_s26 = smov 128   ;;  %s906_s28 = smov 8  }
  0x29   : > { %755 = dma.hbm_to_vmem [thread:$0]  (!%p1002_p12), %s1102_s4, 2048, %s204_s11, [#allocation3], %s905_s26, %s905_s26, %s906_s28  }
  0x2a   : > { %p1112_p13 = scmp.ne.s32.totalorder %s1110_s9, 0 }
  0x2b   : > { %p1113_p1 = scmp.eq.s32.totalorder (!%p1112_p13), %s966_s25, 0 }
  0x2c   : > { %231 = sbr.rel (%p1112_p13) target bundleno = 527 (0x20f), region = 44 }
  0x33   : > { %881 = dma.done.wait (%p1113_p1), [#allocation3], 2048   ;;  %p1114_p0 = pmov %p1113_p1 }
  0x34   : > { %s613_s13 = sshll.u32 %s966_s25, 2  ;;  %vm273_vm0 = vcmask 64512   ;;  %v272_v0 = vld [vmem:[%s1099_s1] sm:$0xff]  ;;  %v407_v5 = vld [vmem:[#allocation2 + $0x8] sm:$0xff]  ;;  %v408_v6 = vld [vmem:[#allocation2 + $0x10] sm:$0xff]  ;;  %v385_v29 = vlaneseq  ;;  %s258_s26 = sand.u32 1, %s894_s22  }
  0x35   : > { %883 = vsyncadd (%p1114_p0), [#allocation3], 4294965248  ;;  %p262_p5 = scmp.lt.s32.totalorder %s613_s13, 7  ;;  %652 = vmatprep.subr.mxu0 %v272_v0  ;;  %v406_v4 = vld [vmem:[#allocation2] sm:$0xff]  ;;  %v409_v7 = vld [vmem:[#allocation2 + $0x18] sm:$0xff]  ;;  %s612_s28 = sshll.u32 %s258_s26, 5 }
  0x36   : > { %653 = vmatpush3.msra.mxu0 %v272_v0  ;;  %v698_v8 = vpack.c.bf16 %v407_v5, %v406_v4  ;;  %v702_v9 = vpack.c.bf16 %v409_v7, %v408_v6  ;;  %v410_v11 = vld [vmem:[#allocation2 + $0x20] sm:$0xff]  ;;  %v411_v12 = vld [vmem:[#allocation2 + $0x28] sm:$0xff]  ;;  %v412_v14 = vld [vmem:[#allocation2 + $0x30] sm:$0xff]  ;;  %v386_v30 = vshrl.u32 %v385_v29, 7  ;;  %s626_s12 = sshll.u32 %s966_s25, 9  ;;  %s1057_s17 = scalar_lea.sflag [#allocation4], %s258_s26 }
  0x37   : > { %s1122_s13 = smov (!%p262_p5, %s613_s13), 7  ;;  %v706_v13 = vpack.c.bf16 %v411_v12, %v410_v11  ;;  %v413_v15 = vld [vmem:[#allocation2 + $0x38] sm:$0xff]  ;;  %v414_v17 = vld [vmem:[#allocation2 + $0x40] sm:$0xff]  ;;  %v415_v18 = vld [vmem:[#allocation2 + $0x48] sm:$0xff]  ;;  %s1055_s11 = scalar_lea.hbm %s1104_s6, %s626_s12 }
  0x38   : > { %s614_s14 = sshll.u32 %s1122_s13, 3  ;;  %699 = vmatprep.subr.bf16.mxu0 %v698_v8  ;;  %730 = vmatprep.subr.bf16.mxu1 %v698_v8  ;;  %v710_v16 = vpack.c.bf16 %v413_v15, %v412_v14  ;;  %v714_v19 = vpack.c.bf16 %v415_v18, %v414_v17  ;;  %v416_v20 = vld [vmem:[#allocation2 + $0x50] sm:$0xff]  ;;  %v417_v21 = vld [vmem:[#allocation2 + $0x58] sm:$0xff]  ;;  %v418_v23 = vld [vmem:[#allocation2 + $0x60] sm:$0xff]  ;;  %v387_v33 = vsub.s32 0, %v386_v30  ;;  %s260_s13 = scalar_lea.vmem [#allocation5], %s612_s28 }
  0x39   : > { %s265_s16 = scalar_lea.vmem %s1098_s0, %s614_s14  ;;  %738 = vmatpush3.bf16.msra.mxu1 %v698_v8  ;;  %v718_v22 = vpack.c.bf16 %v417_v21, %v416_v20  ;;  %v419_v24 = vld [vmem:[#allocation2 + $0x68] sm:$0xff]  ;;  %v420_v26 = vld [vmem:[#allocation2 + $0x70] sm:$0xff]  ;;  %v421_v27 = vld [vmem:[#allocation2 + $0x78] sm:$0xff]  ;;  %s532_s14 = sshll.u32 %s260_s13, 4  ;;  %s1050_s14 = int_to_ptr.vmem [resolvable:$true] %s532_s14 }
  0x3a   : > { %v268_v1 = vld [vmem:[%s265_s16] sm:$0xff]  ;;  %v269_v2 = vld [vmem:[%s265_s16 + $0x8] sm:$0xff]  ;;  %v270_v3 = vld [vmem:[%s265_s16 + $0x10] sm:$0xff]  ;;  %731 = vmatprep.subr.bf16.mxu1 %v702_v9  ;;  %v722_v25 = vpack.c.bf16 %v419_v24, %v418_v23  ;;  %v726_v28 = vpack.c.bf16 %v421_v27, %v420_v26  ;;  %s836_s25 = scalar_lea.vmem %s1050_s14, 512  ;;  %p1115_p9 = scmp.ne.s32.totalorder %s1108_s7, 0 }
  0x3b   : > { %654 = vmatprep.mubr.msk.f32.mxu0 %vm273_vm0, %v268_v1  ;;  %v271_v10 = vld [vmem:[%s265_s16 + $0x18] sm:$0xff]  ;;  %v382_v31 = vld [vmem:[%s1101_s3] sm:$0x1]  ;;  %p837_p6 = scmp.ne.s32.totalorder %s1050_s14, %s836_s25  ;;  %s907_s9 = smov [#allocation5]  }
  0x3c   : > { %655 = vmatmul.mubr.msk.f32.vlgmr.msra.gmra.mrb[0].mxu0 %vm273_vm0, %v269_v2  ;;  %v383_v32 = vsub.f32 0.0, %v382_v31  ;;  %v619_v34 = vld [vmem:[%s1100_s2] ss:$0 sm:$0xff]  ;;  %s840_s18 = sshll.u32 %s907_s9, 4  ;;  %s841_s18 = int_to_ptr.vmem [resolvable:$false] %s840_s18 }
  0x3d   : > { %657 = vmatprep.mubr.msk.f32.mxu0 %vm273_vm0, %v270_v3  ;;  %701 = vmatpush3.bf16.msra.mxu0 %v698_v8  ;;  %v620_v60 = vld [vmem:[%s1103_s5] ss:$0 sm:$0xff]  ;;  %p838_p10 = pnand %p837_p6, %p1115_p9  ;;  %s842_s19 = scalar_lea.vmem %s841_s18, 1024 }
  0x3e   : > { %703 = vmatprep.subr.bf16.mxu0 %v702_v9  ;;  %739 = vmatpush3.bf16.msra.mxu1 %v702_v9  ;;  %v388_v35 = vrot.slane %v383_v32, %v387_v33  ;;  %p843_p2 = scmp.lt.s32.totalorder %s1050_s14, %s841_s18  ;;  %p844_p3 = scmp.lt.s32.totalorder %s842_s19, %s836_s25 }
  0x3f   : > { %732 = vmatprep.subr.bf16.mxu1 %v706_v13  ;;  %p839_p12 = pneg %p838_p10 }
  0x40   : > { %658 = vmatmul.mubr.msk.f32.gmra.mrb[2].mxu0 %vm273_vm0, %v271_v10  ;;  %p845_p4 = por %p844_p3, %p843_p2 }
  0x41   : > { %705 = vmatpush3.bf16.msra.mxu0 %v702_v9 }
  0x42   : > { %707 = vmatprep.subr.bf16.mxu0 %v706_v13  ;;  %740 = vmatpush3.bf16.msra.mxu1 %v706_v13  ;;  %p846_p7 = pnand %p845_p4, %p839_p12 }
  0x43   : > { %733 = vmatprep.subr.bf16.mxu1 %v710_v16 }
  0x45   : > { %709 = vmatpush3.bf16.msra.mxu0 %v706_v13 }
  0x46   : > { %711 = vmatprep.subr.bf16.mxu0 %v710_v16  ;;  %741 = vmatpush3.bf16.msra.mxu1 %v710_v16 }
  0x47   : > { %734 = vmatprep.subr.bf16.mxu1 %v714_v19 }
  0x49   : > { %713 = vmatpush3.bf16.msra.mxu0 %v710_v16 }
  0x4a   : > { %715 = vmatprep.subr.bf16.mxu0 %v714_v19  ;;  %742 = vmatpush3.bf16.msra.mxu1 %v714_v19 }
  0x4b   : > { %735 = vmatprep.subr.bf16.mxu1 %v718_v22 }
  0x4d   : > { %717 = vmatpush3.bf16.msra.mxu0 %v714_v19 }
  0x4e   : > { %719 = vmatprep.subr.bf16.mxu0 %v718_v22  ;;  %743 = vmatpush3.bf16.msra.mxu1 %v718_v22 }
  0x4f   : > { %736 = vmatprep.subr.bf16.mxu1 %v722_v25 }
  0x51   : > { %721 = vmatpush3.bf16.msra.mxu0 %v718_v22 }
  0x52   : > { %723 = vmatprep.subr.bf16.mxu0 %v722_v25  ;;  %744 = vmatpush3.bf16.msra.mxu1 %v722_v25 }
  0x53   : > { %737 = vmatprep.subr.bf16.mxu1 %v726_v28 }
  0x55   : > { %725 = vmatpush3.bf16.msra.mxu0 %v722_v25 }
  0x56   : > { %727 = vmatprep.subr.bf16.mxu0 %v726_v28  ;;  %745 = vmatpush3.bf16.msra.mxu1 %v726_v28 }
  0x59   : > { %729 = vmatpush3.bf16.msra.mxu0 %v726_v28 }
 0x10f   : > { %v656_v36 = vpop.f32.mrb[0].mxu0 }
 0x110   : > { %v379_v37 = vsub.f32 %v656_v36, %v619_v34  ;;  %v352_v38 = vpop.f32.mrb[1].mxu0 }
 0x111   : > { %v378_v39 = vsub.f32 %v352_v38, %v619_v34 }
 0x112   : > { %v391_v40 = vmul.f32 %v388_v35, %v379_v37 }
 0x113   : > { %v390_v41 = vmul.f32 %v388_v35, %v378_v39  ;;  %v659_v42 = vpop.f32.mrb[2].mxu0 }
 0x114   : > { %v395_v43 = vmul.f32 %v391_v40, %v379_v37  ;;  %v381_v44 = vsub.f32 %v659_v42, %v619_v34  ;;  %v362_v45 = vpop.f32.mrb[3].mxu0 }
 0x115   : > { %v394_v46 = vmul.f32 %v390_v41, %v378_v39  ;;  %v380_v47 = vsub.f32 %v362_v45, %v619_v34 }
 0x116   : > { %v400_v48 = vmul.f32 1.442695, %v395_v43  ;;  %v393_v49 = vmul.f32 %v388_v35, %v381_v44 }
 0x117   : > { %v398_v50 = vmul.f32 1.442695, %v394_v46  ;;  %v392_v51 = vmul.f32 %v388_v35, %v380_v47 }
 0x118   : > { %v397_v52 = vmul.f32 %v393_v49, %v381_v44 }
 0x119   : > { %800 = vpow2.f32 %v398_v50  ;;  %v396_v53 = vmul.f32 %v392_v51, %v380_v47 }
 0x11a   : > { %802 = vpow2.f32 %v400_v48  ;;  %v404_v54 = vmul.f32 1.442695, %v397_v52 }
 0x11b   : > { %v402_v55 = vmul.f32 1.442695, %v396_v53 }
 0x11d   : > { %804 = vpow2.f32 %v402_v55 }
 0x11e   : > { %806 = vpow2.f32 %v404_v54 }
 0x123   : > { %v801_v56 = vpop.eup %800 }
 0x124   : > { %v803_v57 = vpop.eup %802  ;;  %692 = vmatprep.mubr.f32.mxu0 %v801_v56 }
 0x125   : > { %693 = vmatmul.mubr.f32.vlgmr.msra.gmra.mrb[4].mxu0 %v803_v57 }
 0x127   : > { %v805_v58 = vpop.eup %804 }
 0x128   : > { %v807_v59 = vpop.eup %806  ;;  %695 = vmatprep.mubr.f32.mxu1 %v805_v58 }
 0x129   : > { %696 = vmatmul.mubr.f32.vlgmr.msra.gmra.mrb[0].mxu1 %v807_v59 }
 0x1f8   : > { %v694_v61 = vpop.f32.mrb[4].mxu0 }
 0x1f9   : > { %v501_v62 = vadd.f32 %v694_v61, %v620_v60  ;;  %v495_v63 = vpop.f32.mrb[5].mxu0 }
 0x1fa   : > { %v496_v0 = vadd.f32 %v620_v60, %v495_v63 }
 0x1fb   : > { %515 = vst [vmem:[%s260_s13 + $0x8] sm:$0xff] %v501_v62 }
 0x1fc   : > { %514 = vst [vmem:[%s260_s13] sm:$0xff] %v496_v0  ;;  %v697_v1 = vpop.f32.mrb[0].mxu1 }
 0x1fd   : > { %v511_v2 = vadd.f32 %v697_v1, %v620_v60  ;;  %v505_v3 = vpop.f32.mrb[1].mxu1 }
 0x1fe   : > { %v506_v4 = vadd.f32 %v620_v60, %v505_v3 }
 0x1ff   : > { %517 = vst [vmem:[%s260_s13 + $0x18] sm:$0xff] %v511_v2 }
 0x200   : > { %516 = vst [vmem:[%s260_s13 + $0x10] sm:$0xff] %v506_v4 }
 0x201   : > { %849 = shalt.err (!%p846_p7)
}
 0x202   : > { %s850_s20 = scalar_lea.hbm %s1055_s11, 512  ;;  %s854_s29 = scalar_lea.hbm %s1104_s6, 1024 }
 0x203   : > { %p851_p8 = scmp.ne.s32.totalorder %s1055_s11, %s850_s20  ;;  %p855_p1 = scmp.lt.u32.totalorder %s1055_s11, %s1104_s6 }
 0x204   : > { %p856_p0 = scmp.lt.u32.totalorder %s854_s29, %s850_s20  ;;  %p858_p6 = scmp.lt.u32.totalorder %s850_s20, %s1055_s11 }
 0x205   : > { %p852_p11 = pnand %p851_p8, %p1115_p9 }
 0x206   : > { %p857_p5 = por %p856_p0, %p855_p1 }
 0x207   : > { %p853_p13 = pneg %p852_p11 }
 0x208   : > { %p859_p10 = por %p858_p6, %p857_p5 }
 0x20a   : > { %p860_p12 = pnand %p859_p10, %p853_p13 }
 0x20c   : > { %863 = shalt.err (!%p860_p12)
}
 0x20d   : > { %s908_s12 = smov 128   ;;  %s909_s15 = smov 8  }
 0x20e   : > { %750 = dma.vmem_to_hbm [thread:$0]  (%p1115_p9), %s1050_s14, 512, %s1055_s11, %s1057_s17, %s908_s12, %s908_s12, %s909_s15  }
 0x20f PF: > { %p762_p2 = scmp.ge.s32.totalorder %s902_s24, 2  ;;  %s547_s16 = sand.u32 1, %s890_s21  }
 0x210   : > { %p1116_p3 = scmp.ne.s32.totalorder %s1109_s8, 0  ;;  %s548_s25 = scalar_lea.sflag [#allocation4], %s547_s16 }
 0x212   : > { %p757_p4 = pnand %p762_p2, %p1116_p3 }
 0x214   : > { %885 = dma.done.wait (!%p757_p4), %s548_s25, 512  }
 0x215   : > { %887 = vsyncadd (!%p757_p4), %s548_s25, 4294966784  ;;  %p17_p7 = scmp.ge.s32.totalorder %s970_s27, 4   ;;  %s1117_s21 = smov %s894_s22 }
 0x216   : > { %s1118_s22 = smov %s898_s23  ;;  %s1119_s23 = smov %s981_s30 }
 0x217   : > { %s1120_s24 = smov %s970_s27  ;;  %19 = sbr.rel (!%p17_p7) target bundleno = 4 (0x4), region = 84 }
 0x21e   :  { %553 = vsyncpa [#allocation3], 1 }
 0x21f   :  { %555 = vsyncpa [#allocation3 + $0x1], 1 }
 0x220   :  { %556 = vsyncpa [#allocation4], 1 }
 0x221   :  { %558 = vsyncpa [#allocation4 + $0x1], 1 }

</bundles_post_ra>
